<compile_context>
chip_gen: v5e
topology: v5e:2x2
jax: 0.10.0
libtpu: 0.0.40
codegen_flags: <defaults>
</compile_context>

<pallas_src>
import functools
import math

import jax
import jax.numpy as jnp
import numpy as np
from jax.experimental import pallas as pl
from jax.experimental.pallas import tpu as pltpu


def _round_up(x: int, m: int) -> int:
    return ((x + m - 1) // m) * m


def _time_embedding_kernel(t_ref, fp_ref, w1_ref, b1_ref, w2_ref, b2_ref,
                           out_ref):
    # t_ref:   (TB, 1)  f32 timesteps (one batch tile)
    # fp_ref:  (2, F)   f32  row 0 = freq, row 1 = phase (baked constants)
    # w1_ref:  (F, H)   bf16 == torch Linear1.weight.T
    # b1_ref:  (1, H)   f32
    # w2_ref:  (H, H)   bf16 == torch Linear2.weight.T
    # b2_ref:  (1, H)   f32
    # out_ref: (TB, H)  f32
    pos = t_ref[...]                                  # (TB, 1)
    freq = fp_ref[0:1, :]                             # (1, F)
    phase = fp_ref[1:2, :]                            # (1, F)

    # Sinusoidal PE in one FMA + one sin: even cols sin(pos*f), odd cols
    # sin(pos*f + pi/2) = cos(pos*f); odd-feats trailing col = sin(0) = 0.
    pe = jnp.sin(pos * freq + phase)                  # (TB, F)

    # MLP: Linear -> ReLU -> Linear, bf16 operands, f32 accumulation.
    h = jnp.dot(pe.astype(jnp.bfloat16), w1_ref[...],
                preferred_element_type=jnp.float32) + b1_ref[...]
    h = jnp.maximum(h, 0.0)
    out = jnp.dot(h.astype(jnp.bfloat16), w2_ref[...],
                  preferred_element_type=jnp.float32) + b2_ref[...]
    out_ref[...] = out.astype(out_ref.dtype)


def time_embedding_forward(timesteps, w1, b1, w2, b2, *, dimensions=2,
                           block_b=512):
    """JAX/Pallas equivalent of TimeEmbedding.forward.

    timesteps: [B] int or float timesteps
    w1: [in_channels, out_channels]  (= torch mlp[0].weight.T)
    b1: [out_channels]
    w2: [out_channels, out_channels] (= torch mlp[2].weight.T)
    b2: [out_channels]
    Returns float32 [B, out_channels] + (1,) * dimensions.
    """
    feats, hidden = w1.shape
    assert w2.shape == (hidden, hidden)
    assert timesteps.ndim == 1, "timesteps must be a 1-D tensor"

    batch = timesteps.shape[0]
    half_dim = feats // 2
    t = timesteps.astype(jnp.float32).reshape(batch, 1)

    # Bake the sinusoid constants on the host:
    #   pe[:, j] = sin(pos * freq[j] + phase[j])
    #   even j: freq = 10000^(-(j/2)/half), phase = 0      -> sin
    #   odd  j: same freq,                  phase = pi/2   -> cos
    #   (odd feats) trailing column: freq = phase = 0      -> 0 (torch zeros)
    freq = np.zeros((feats,), np.float32)
    phase = np.zeros((feats,), np.float32)
    k = np.arange(half_dim, dtype=np.float32)
    f = np.exp(-math.log(10000.0) * k / half_dim)
    freq[0:2 * half_dim:2] = f
    freq[1:2 * half_dim:2] = f
    phase[1:2 * half_dim:2] = np.pi / 2.0
    fp = jnp.asarray(np.stack([freq, phase], axis=0))            # (2, F)

    # Batch tiling: one grid step for small/medium batches (grid-step overhead
    # dominates there); only tile when the batch is genuinely large, keeping
    # the tiles a multiple of 8 sublanes.
    b_pad8 = _round_up(batch, 8)
    if b_pad8 <= block_b:
        tb = b_pad8
    else:
        tb = _round_up(block_b, 8)
    b_pad = _round_up(batch, tb)
    if b_pad != batch:
        t = jnp.pad(t, ((0, b_pad - batch), (0, 0)))
    grid = (b_pad // tb,)

    cost = pl.CostEstimate(
        flops=2 * b_pad * (feats * hidden + hidden * hidden),
        transcendentals=b_pad * feats,
        bytes_accessed=(feats * hidden + hidden * hidden) * 2     # bf16 weights
        + 2 * hidden * 4 + 2 * feats * 4                          # biases + fp
        + b_pad * 4 + b_pad * hidden * 4,                         # in + out
    )

    out = pl.pallas_call(
        _time_embedding_kernel,
        out_shape=jax.ShapeDtypeStruct((b_pad, hidden), jnp.float32),
        grid=grid,
        in_specs=[
            pl.BlockSpec((tb, 1), lambda i: (i, 0)),           # timesteps tile
            pl.BlockSpec((2, feats), lambda i: (0, 0)),        # freq/phase
            pl.BlockSpec((feats, hidden), lambda i: (0, 0)),   # W1 (resident)
            pl.BlockSpec((1, hidden), lambda i: (0, 0)),       # b1
            pl.BlockSpec((hidden, hidden), lambda i: (0, 0)),  # W2 (resident)
            pl.BlockSpec((1, hidden), lambda i: (0, 0)),       # b2
        ],
        out_specs=pl.BlockSpec((tb, hidden), lambda i: (i, 0)),
        compiler_params=pltpu.CompilerParams(
            dimension_semantics=("parallel",)),
        cost_estimate=cost,
    )(t,
      fp,
      w1.astype(jnp.bfloat16),
      b1.reshape(1, hidden).astype(jnp.float32),
      w2.astype(jnp.bfloat16),
      b2.reshape(1, hidden).astype(jnp.float32))

    out = out[:batch]
    # embedding[(...,) + (None,) * dimensions]
    return out.reshape((batch, hidden) + (1,) * dimensions)


def _numpy_reference(timesteps, w1, b1, w2, b2, dimensions):
    pos = np.asarray(timesteps, dtype=np.float32)
    feats = w1.shape[0]
    half = feats // 2
    k = np.arange(half, dtype=np.float32)
    freq = np.exp(np.log(10000.0) * -k / half)
    emb = pos[:, None] * freq[None, :]
    pe = np.zeros((pos.shape[0], feats), dtype=np.float32)
    pe[:, 2 * np.arange(half)] = np.sin(emb)
    pe[:, 2 * np.arange(half) + 1] = np.cos(emb)
    h = np.maximum(pe @ np.asarray(w1) + np.asarray(b1), 0.0)
    out = h @ np.asarray(w2) + np.asarray(b2)
    return out.reshape(out.shape + (1,) * dimensions)


if __name__ == "__main__":
    # Module config: in_channels=32 (PE features), out_channels=128,
    # dimensions=2 -> output [B, 128, 1, 1].
    in_channels = 32
    out_channels = 128
    dimensions = 2

    key = jax.random.PRNGKey(0)
    k_t, k_w1, k_b1, k_w2, k_b2, k_t2 = jax.random.split(key, 6)

    w1 = jax.random.normal(k_w1, (in_channels, out_channels),
                           jnp.float32) / math.sqrt(in_channels)
    b1 = jax.random.normal(k_b1, (out_channels,), jnp.float32) * 0.1
    w2 = jax.random.normal(k_w2, (out_channels, out_channels),
                           jnp.float32) / math.sqrt(out_channels)
    b2 = jax.random.normal(k_b2, (out_channels,), jnp.float32) * 0.1

    # Case 1: small batch -> grid collapses to a single step.
    batch = 8
    timesteps = jax.random.randint(k_t, (batch,), 0, 1000, dtype=jnp.int32)
    out = time_embedding_forward(timesteps, w1, b1, w2, b2,
                                 dimensions=dimensions)
    out = jax.block_until_ready(out)
    assert out.shape == (batch, out_channels, 1, 1), out.shape
    ref = _numpy_reference(timesteps, w1, b1, w2, b2, dimensions)
    np.testing.assert_allclose(np.asarray(out), ref, rtol=2e-2, atol=2e-2)

    # Case 2: exercise the tiled / padded "parallel" batch path.
    batch2 = 48
    timesteps2 = jax.random.randint(k_t2, (batch2,), 0, 1000, dtype=jnp.int32)
    out2 = time_embedding_forward(timesteps2, w1, b1, w2, b2,
                                  dimensions=dimensions, block_b=32)
    out2 = jax.block_until_ready(out2)
    assert out2.shape == (batch2, out_channels, 1, 1), out2.shape
    ref2 = _numpy_reference(timesteps2, w1, b1, w2, b2, dimensions)
    np.testing.assert_allclose(np.asarray(out2), ref2, rtol=2e-2, atol=2e-2)

    print("KERNEL_OK")
</pallas_src>

<mosaic_0001>
module attributes {stable_mosaic.version = 11 : i64} {
  func.func @_time_embedding_kernel(%arg0: i32, %arg1: memref<8x1xf32, #tpu.memory_space<vmem>>, %arg2: memref<2x32xf32, #tpu.memory_space<vmem>>, %arg3: memref<32x128xbf16, #tpu.memory_space<vmem>>, %arg4: memref<1x128xf32, #tpu.memory_space<vmem>>, %arg5: memref<128x128xbf16, #tpu.memory_space<vmem>>, %arg6: memref<1x128xf32, #tpu.memory_space<vmem>>, %arg7: memref<8x128xf32, #tpu.memory_space<vmem>>) attributes {dimension_semantics = [#tpu.dimension_semantics<parallel>], iteration_bounds = array<i64: 1>, scalar_prefetch = 0 : i64, scratch_operands = 0 : i64, tpu.core_type = #tpu.core_type<tc>, window_params = [{transform_indices = @transform_0, window_bounds = array<i64: 8, 1>}, {pipeline_mode = #tpu.pipeline_mode<synchronous>, transform_indices = @transform_1, window_bounds = array<i64: 2, 32>}, {pipeline_mode = #tpu.pipeline_mode<synchronous>, transform_indices = @transform_2, window_bounds = array<i64: 32, 128>}, {pipeline_mode = #tpu.pipeline_mode<synchronous>, transform_indices = @transform_3, window_bounds = array<i64: 1, 128>}, {pipeline_mode = #tpu.pipeline_mode<synchronous>, transform_indices = @transform_4, window_bounds = array<i64: 128, 128>}, {pipeline_mode = #tpu.pipeline_mode<synchronous>, transform_indices = @transform_5, window_bounds = array<i64: 1, 128>}, {transform_indices = @transform_6, window_bounds = array<i64: 8, 128>}]} {
    %c0 = arith.constant 0 : index
    %c0_0 = arith.constant 0 : index
    %0 = vector.load %arg1[%c0, %c0_0] : memref<8x1xf32, #tpu.memory_space<vmem>>, vector<8x1xf32>
    %c0_1 = arith.constant 0 : index
    %c0_2 = arith.constant 0 : index
    %1 = vector.load %arg2[%c0_1, %c0_2] : memref<2x32xf32, #tpu.memory_space<vmem>>, vector<1x32xf32>
    %c1 = arith.constant 1 : index
    %c0_3 = arith.constant 0 : index
    %2 = vector.load %arg2[%c1, %c0_3] : memref<2x32xf32, #tpu.memory_space<vmem>>, vector<1x32xf32>
    %3 = vector.broadcast %0 : vector<8x1xf32> to vector<8x32xf32>
    %4 = vector.broadcast %1 : vector<1x32xf32> to vector<8x32xf32>
    %5 = arith.mulf %3, %4 : vector<8x32xf32>
    %6 = vector.broadcast %2 : vector<1x32xf32> to vector<8x32xf32>
    %7 = arith.addf %5, %6 : vector<8x32xf32>
    %8 = math.sin %7 : vector<8x32xf32>
    %9 = arith.truncf %8 : vector<8x32xf32> to vector<8x32xbf16>
    %c0_4 = arith.constant 0 : index
    %c0_5 = arith.constant 0 : index
    %10 = vector.load %arg3[%c0_4, %c0_5] : memref<32x128xbf16, #tpu.memory_space<vmem>>, vector<32x128xbf16>
    %cst = arith.constant dense<0.000000e+00> : vector<8x128xf32>
    %11 = tpu.matmul %9, %10, %cst {dimension_numbers = #tpu.dot_dimension_numbers<[1], [0], [0], [1], [0, 0, 1, 1], [], []>} : vector<8x32xbf16>, vector<32x128xbf16>, vector<8x128xf32> -> vector<8x128xf32>
    %c0_6 = arith.constant 0 : index
    %c0_7 = arith.constant 0 : index
    %12 = vector.load %arg4[%c0_6, %c0_7] : memref<1x128xf32, #tpu.memory_space<vmem>>, vector<1x128xf32>
    %13 = vector.broadcast %12 : vector<1x128xf32> to vector<8x128xf32>
    %14 = arith.addf %11, %13 : vector<8x128xf32>
    %cst_8 = arith.constant 0.000000e+00 : f32
    %15 = vector.broadcast %cst_8 : f32 to vector<8x128xf32>
    %16 = arith.maximumf %14, %15 : vector<8x128xf32>
    %17 = arith.truncf %16 : vector<8x128xf32> to vector<8x128xbf16>
    %c0_9 = arith.constant 0 : index
    %c0_10 = arith.constant 0 : index
    %18 = vector.load %arg5[%c0_9, %c0_10] : memref<128x128xbf16, #tpu.memory_space<vmem>>, vector<128x128xbf16>
    %cst_11 = arith.constant dense<0.000000e+00> : vector<8x128xf32>
    %19 = tpu.matmul %17, %18, %cst_11 {dimension_numbers = #tpu.dot_dimension_numbers<[1], [0], [0], [1], [0, 0, 1, 1], [], []>} : vector<8x128xbf16>, vector<128x128xbf16>, vector<8x128xf32> -> vector<8x128xf32>
    %c0_12 = arith.constant 0 : index
    %c0_13 = arith.constant 0 : index
    %20 = vector.load %arg6[%c0_12, %c0_13] : memref<1x128xf32, #tpu.memory_space<vmem>>, vector<1x128xf32>
    %21 = vector.broadcast %20 : vector<1x128xf32> to vector<8x128xf32>
    %22 = arith.addf %19, %21 : vector<8x128xf32>
    %c0_14 = arith.constant 0 : index
    %c0_15 = arith.constant 0 : index
    %23 = vector.load %arg7[%c0_14, %c0_15] : memref<8x128xf32, #tpu.memory_space<vmem>>, vector<8x128xf32>
    tpu.vector_store %arg7[%c0_14, %c0_15], %22 {strides = array<i32>} : memref<8x128xf32, #tpu.memory_space<vmem>>, vector<8x128xf32>,
    return
  }
  func.func @transform_0(%arg0: i32) -> (i32, i32) {
    %c0_i32 = arith.constant 0 : i32
    %c0_i32_0 = arith.constant 0 : i32
    return %arg0, %c0_i32 : i32, i32
  }
  func.func @transform_1(%arg0: i32) -> (i32, i32) {
    %c0_i32 = arith.constant 0 : i32
    %c0_i32_0 = arith.constant 0 : i32
    %c0_i32_1 = arith.constant 0 : i32
    return %c0_i32, %c0_i32_0 : i32, i32
  }
  func.func @transform_2(%arg0: i32) -> (i32, i32) {
    %c0_i32 = arith.constant 0 : i32
    %c0_i32_0 = arith.constant 0 : i32
    %c0_i32_1 = arith.constant 0 : i32
    return %c0_i32, %c0_i32_0 : i32, i32
  }
  func.func @transform_3(%arg0: i32) -> (i32, i32) {
    %c0_i32 = arith.constant 0 : i32
    %c0_i32_0 = arith.constant 0 : i32
    %c0_i32_1 = arith.constant 0 : i32
    return %c0_i32, %c0_i32_0 : i32, i32
  }
  func.func @transform_4(%arg0: i32) -> (i32, i32) {
    %c0_i32 = arith.constant 0 : i32
    %c0_i32_0 = arith.constant 0 : i32
    %c0_i32_1 = arith.constant 0 : i32
    return %c0_i32, %c0_i32_0 : i32, i32
  }
  func.func @transform_5(%arg0: i32) -> (i32, i32) {
    %c0_i32 = arith.constant 0 : i32
    %c0_i32_0 = arith.constant 0 : i32
    %c0_i32_1 = arith.constant 0 : i32
    return %c0_i32, %c0_i32_0 : i32, i32
  }
  func.func @transform_6(%arg0: i32) -> (i32, i32) {
    %c0_i32 = arith.constant 0 : i32
    %c0_i32_0 = arith.constant 0 : i32
    return %arg0, %c0_i32 : i32, i32
  }
}

</mosaic_0001>

<bundles_post_ra>
// kernel: tpu_custom_call.1
= control target key start
LH: loop header
LB: loop body
LE: loop exit
PB: predicated region body
PF: predicated region fallthrough
CT: control target
= control target key end

     0   :  { %11 = vsyncpa [#allocation3], 0  ;;  %s653_s0 = inlined_call_operand.vmem [shape: f32[8,1], index: 0, kind: input, shape index: {}]   ;;  %s654_s1 = inlined_call_operand.vmem [shape: f32[2,32], index: 1, kind: input, shape index: {}]   ;;  %s655_s2 = inlined_call_operand.hbm [shape: bf16[32,128], index: 2, kind: input, shape index: {}]   ;;  %s656_s3 = inlined_call_operand.vmem [shape: f32[1,128], index: 3, kind: input, shape index: {}]   ;;  %s657_s4 = inlined_call_operand.hbm [shape: bf16[128,128], index: 4, kind: input, shape index: {}]   ;;  %s658_s5 = inlined_call_operand.vmem [shape: f32[1,128], index: 5, kind: input, shape index: {}]   ;;  %s659_s6 = inlined_call_operand.hbm [shape: f32[8,128], index: 6, kind: output, shape index: {}]  }
   0x1   :  { %12 = vsyncpa [#allocation6], 0 }
   0x2   :  { %13 = vsyncpa [#allocation4], 0  ;;  %s22_s23 = sshll.u32 %s655_s2, 4  ;;  %s513_s24 = smov [#allocation2]   ;;  %s23_s23 = int_to_ptr.hbm [resolvable:$true] %s22_s23 }
   0x3   :  { %s24_s25 = sshll.u32 %s513_s24, 4  ;;  %s37_s28 = sshll.u32 %s657_s4, 4  ;;  %s25_s25 = int_to_ptr.vmem [resolvable:$true] %s24_s25  ;;  %s38_s28 = int_to_ptr.hbm [resolvable:$true] %s37_s28 }
   0x4   :  { %s514_s29 = smov 64   ;;  %s515_s30 = smov 4  }
   0x5   :  { %30 = dma.hbm_to_vmem [thread:$0]  %s23_s23, 256, %s25_s25, [#allocation3], %s514_s29, %s514_s29, %s515_s30  }
   0x6   :  { %s516_s7 = smov [#allocation5]  }
   0x7   :  { %s39_s8 = sshll.u32 %s516_s7, 4  ;;  %s40_s8 = int_to_ptr.vmem [resolvable:$true] %s39_s8 }
   0x8   :  { %45 = dma.hbm_to_vmem [thread:$0]  %s38_s28, 1024, %s40_s8, [#allocation6], %s514_s29, %s514_s29, %s515_s30  }
   0x9   :  { %507 = dma.done.wait [#allocation3], 256  }
   0xa   :  { %508 = vsyncadd [#allocation3], 4294967040 }
   0xb   :  { %509 = dma.done.wait [#allocation6], 1024  }
   0xc   :  { %510 = vsyncadd [#allocation6], 4294966272  ;;  %v517_v0 = vmov 0   ;;  %v57_v1 = vld [vmem:[%s653_s0] sm:$0xff]  ;;  %v409_v6 = vld [vmem:[#allocation2 + $0x8] sm:$0xff]  ;;  %s524_s15 = smov [#allocation7]  }
   0xd   :  { %430 = vset.pattern.permute.xlu0 %v517_v0  ;;  %v431_v2 = vld [vmem:[%s654_s1] ss:$0 sm:$0xff]  ;;  %v432_v3 = vld [vmem:[%s654_s1 + $0x1] ss:$0 sm:$0xff]  ;;  %255 = vmatpush.bf16.msra.mxu0 %v409_v6  ;;  %v518_v20 = vmov 683565275  }
   0xe   :  { %62 = vperm.xlu0 %430, %v57_v1   ;;  %v408_v8 = vld [vmem:[#allocation2] sm:$0xff]  ;;  %v519_v22 = vmov 2475754826   ;;  %v520_v25 = vmov 2131351028   ;;  %s351_s16 = sshll.u32 %s524_s15, 4  ;;  %s352_s16 = int_to_ptr.vmem [resolvable:$true] %s351_s16 }
   0xf   :  { %v521_v28 = vmov 2102212464   ;;  %v522_v31 = vmov 920167782   ;;  %v523_v34 = vmov 1326507024  }
  0x10   :  { %s353_s19 = sshll.u32 %s659_s6, 4  ;;  %s354_s19 = int_to_ptr.hbm [resolvable:$true] %s353_s19 }
  0x11   :  { %256 = vmatpush.bf16.msra.mxu0 %v408_v8 }
  0x80   :  { %v63_v4 = vpop.permute.xlu0 %62 }
  0x81   :  { %v66_v5 = vmul.f32 %v431_v2, %v63_v4 }
  0x83   :  { %v576_v7 = vadd.f32 %v432_v3, %v66_v5 }
  0x85   :  { %v72_v9 = vand.u32 2139095040, %v576_v7  ;;  %v69_v12 = vand.u32 2147483647, %v576_v7  ;;  %vm71_vm12 = vcmp.lt.s32.totalorder %v576_v7, 0 }
  0x87   :  { %v73_v10 = vshrl.u32 %v72_v9, 23  ;;  %v76_v14 = vand.u32 8388607, %v69_v12  ;;  %vm634_vm13 = vcmp.le.f32.partialorder %v69_v12, 0.7853982 }
  0x89   :  { %v364_v11 = vadd.s32 4294967169, %v73_v10  ;;  %v77_v18 = vor.u32 8388608, %v76_v14 }
  0x8b   :  { %v79_v13 = vadd.s32 1, %v364_v11  ;;  %v593_v41 = vshll.u32 %v77_v18, 8 }
  0x8d   :  { %vm80_vm0 = vcmp.gt.s32.totalorder %v79_v13, 0  ;;  %v118_v50 = vand.u32 65535, %v593_v41  ;;  %v119_v55 = vshrl.u32 %v593_v41, 16 }
  0x8e   :  { %v81_v15 = vsel %vm80_vm0, %v79_v13, 0 }
  0x8f   :  { %v83_v16 = vand.u32 31, %v81_v15  ;;  %v584_v19 = vshrl.u32 %v81_v15, 5 }
  0x91   :  { %v582_v17 = vsub.s32 32, %v83_v16  ;;  %v86_v21 = vshll.u32 %v518_v20, %v83_v16  ;;  %v89_v23 = vshll.u32 %v519_v22, %v83_v16  ;;  %v92_v27 = vshll.u32 %v520_v25, %v83_v16 }
  0x92   :  { %v95_v30 = vshll.u32 %v521_v28, %v83_v16  ;;  %v98_v33 = vshll.u32 %v522_v31, %v83_v16  ;;  %vm101_vm1 = vcmp.lt.s32.totalorder %v584_v19, 1  ;;  %vm104_vm2 = vcmp.lt.s32.totalorder %v584_v19, 4 }
  0x93   :  { %v87_v24 = vshrl.u32 %v519_v22, %v582_v17  ;;  %v90_v26 = vshrl.u32 %v520_v25, %v582_v17  ;;  %v93_v29 = vshrl.u32 %v521_v28, %v582_v17  ;;  %v96_v32 = vshrl.u32 %v522_v31, %v582_v17 }
  0x94   :  { %v99_v35 = vshrl.u32 %v523_v34, %v582_v17  ;;  %vm103_vm3 = vcmp.lt.s32.totalorder %v584_v19, 3  ;;  %vm102_vm4 = vcmp.lt.s32.totalorder %v584_v19, 2  ;;  %v85_v14 = vshrl.u32 %v518_v20, %v582_v17 }
  0x95   :  { %v88_v36 = vor.u32 %v87_v24, %v86_v21  ;;  %v91_v37 = vor.u32 %v90_v26, %v89_v23  ;;  %v94_v38 = vor.u32 %v93_v29, %v92_v27  ;;  %v97_v39 = vor.u32 %v96_v32, %v95_v30 }
  0x96   :  { %v100_v40 = vor.u32 %v99_v35, %v98_v33 }
  0x97   :  { %v109_v42 = vsel %vm101_vm1, %v88_v36, %v91_v37  ;;  %v113_v43 = vsel %vm101_vm1, %v91_v37, %v94_v38  ;;  %v110_v44 = vsel %vm104_vm2, %v97_v39, 920167782  ;;  %v106_v8 = vsel %vm104_vm2, %v94_v38, 2102212464 }
  0x98   :  { %v114_v45 = vsel %vm104_vm2, %v100_v40, 1326507024  ;;  %v111_v46 = vsel %vm103_vm3, %v94_v38, %v110_v44  ;;  %v105_v24 = vsel %vm101_vm1, %v85_v14, %v88_v36  ;;  %v107_v25 = vsel %vm103_vm3, %v91_v37, %v106_v8  ;;  %v413_v8 = vld [vmem:[#allocation5 + $0x18] sm:$0xff] }
  0x99   :  { %v115_v47 = vsel %vm103_vm3, %v97_v39, %v114_v45  ;;  %v112_v48 = vsel %vm102_vm4, %v109_v42, %v111_v46  ;;  %v108_v17 = vsel %vm102_vm4, %v105_v24, %v107_v25  ;;  %vm212_vm1 = vweird.f32 %v576_v7 }
  0x9a   :  { %v116_v49 = vsel %vm102_vm4, %v113_v43, %v115_v47  ;;  %v142_v53 = vand.u32 65535, %v112_v48  ;;  %v143_v54 = vshrl.u32 %v112_v48, 16  ;;  %v162_v32 = vmul.u32 %v593_v41, %v108_v17 }
  0x9b   :  { %v120_v51 = vand.u32 65535, %v116_v49  ;;  %v121_v52 = vshrl.u32 %v116_v49, 16  ;;  %vm245_vm2 = vcmask 261120  }
  0x9c   :  { %v145_v57 = vmul.u32 %v143_v54, %v118_v50  ;;  %v146_v59 = vmul.u32 %v142_v53, %v119_v55  ;;  %v144_v62 = vmul.u32 %v142_v53, %v118_v50  ;;  %v147_v2 = vmul.u32 %v143_v54, %v119_v55 }
  0x9d   :  { %v123_v56 = vmul.u32 %v121_v52, %v118_v50  ;;  %v124_v58 = vmul.u32 %v120_v51, %v119_v55  ;;  %v122_v60 = vmul.u32 %v120_v51, %v118_v50  ;;  %v125_v1 = vmul.u32 %v121_v52, %v119_v55  ;;  %v417_v52 = vld [vmem:[#allocation5 + $0x38] sm:$0xff]  ;;  %v416_v55 = vld [vmem:[#allocation5 + $0x30] sm:$0xff] }
  0x9e   :  { %v148_v63 = vshll.u32 %v145_v57, 16  ;;  %v150_v4 = vshll.u32 %v146_v59, 16  ;;  %v149_v22 = vshrl.u32 %v145_v57, 16  ;;  %v151_v28 = vshrl.u32 %v146_v59, 16  ;;  %332 = vmatpush.bf16.msra.mxu1 %v417_v52 }
  0x9f   :  { %v126_v61 = vshll.u32 %v123_v56, 16  ;;  %v128_v3 = vshll.u32 %v124_v58, 16  ;;  %v127_v18 = vshrl.u32 %v123_v56, 16  ;;  %v129_v26 = vshrl.u32 %v124_v58, 16  ;;  %v415_v58 = vld [vmem:[#allocation5 + $0x28] sm:$0xff] }
  0xa0   :  { %vm152_vm6 = vc.u32 %v144_v62, %v148_v63  ;;  %v154_v6 = vadd.s32 %v148_v63, %v144_v62 }
  0xa1   :  { %vm130_vm5 = vc.u32 %v122_v60, %v126_v61  ;;  %v132_v5 = vadd.s32 %v126_v61, %v122_v60  ;;  %v153_v10 = vsel %vm152_vm6, 1, %v517_v0 }
  0xa2   :  { %v131_v9 = vsel %vm130_vm5, 1, %v517_v0  ;;  %v155_v13 = vadd.s32 %v153_v10, %v147_v2  ;;  %vm156_vm8 = vc.u32 %v154_v6, %v150_v4  ;;  %v158_v30 = vadd.s32 %v154_v6, %v150_v4  ;;  %333 = vmatpush.bf16.msra.mxu1 %v416_v55 }
  0xa3   :  { %v133_v11 = vadd.s32 %v131_v9, %v125_v1  ;;  %vm134_vm7 = vc.u32 %v132_v5, %v128_v3  ;;  %v157_v16 = vsel %vm156_vm8, 1, %v517_v0  ;;  %v414_v1 = vld [vmem:[#allocation5 + $0x20] sm:$0xff] }
  0xa4   :  { %v135_v15 = vsel %vm134_vm7, 1, %v517_v0  ;;  %v159_v23 = vadd.s32 %v157_v16, %v155_v13 }
  0xa5   :  { %v137_v21 = vadd.s32 %v135_v15, %v133_v11  ;;  %v412_v15 = vld [vmem:[#allocation5 + $0x10] sm:$0xff] }
  0xa6   :  { %v160_v29 = vadd.s32 %v159_v23, %v149_v22  ;;  %334 = vmatpush.bf16.msra.mxu1 %v415_v58 }
  0xa7   :  { %v138_v27 = vadd.s32 %v137_v21, %v127_v18 }
  0xa8   :  { %v161_v0 = vadd.s32 %v160_v29, %v151_v28 }
  0xa9   :  { %v139_v20 = vadd.s32 %v138_v27, %v129_v26 }
  0xaa   :  { %v165_v31 = vadd.s32 1, %v161_v0  ;;  %335 = vmatpush.bf16.msra.mxu1 %v414_v1 }
  0xab   :  { %vm164_vm9 = vc.u32 %v139_v20, %v158_v30  ;;  %v163_v44 = vadd.s32 %v158_v30, %v139_v20  ;;  %v411_v30 = vld [vmem:[#allocation5 + $0x8] sm:$0xff] }
  0xac   :  { %v166_v33 = vsel %vm164_vm9, %v165_v31, %v161_v0  ;;  %v410_v0 = vld [vmem:[#allocation5] sm:$0xff]  ;;  %v433_v31 = vld [vmem:[%s656_s3] ss:$0 sm:$0xff] }
  0xad   :  { %v167_v34 = vadd.s32 %v166_v33, %v162_v32 }
  0xae   :  { %336 = vmatpush.bf16.msra.mxu1 %v413_v8 }
  0xaf   :  { %v168_v35 = vadd.s32 536870912, %v167_v34 }
  0xb1   :  { %v169_v36 = vshrl.u32 %v168_v35, 30 }
  0xb2   :  { %337 = vmatpush.bf16.msra.mxu1 %v412_v15 }
  0xb3   :  { %v170_v38 = vshll.u32 %v169_v36, 30  ;;  %v193_v61 = vsub.s32 4, %v169_v36 }
  0xb5   :  { %v171_v37 = vsub.s32 %v167_v34, %v170_v38  ;;  %v194_v4 = vsel %vm71_vm12, %v193_v61, %v169_v36 }
  0xb6   :  { %v196_v12 = vsel %vm634_vm13, 0, %v194_v4  ;;  %338 = vmatpush.bf16.msra.mxu1 %v411_v30 }
  0xb7   :  { %vm172_vm10 = vcmp.lt.s32.totalorder %v171_v37, 0  ;;  %v173_v39 = vsub.s32 0, %v171_v37  ;;  %v213_v14 = vadd.s32 3, %v196_v12 }
  0xb9   :  { %v174_v40 = vsel %vm172_vm10, %v173_v39, %v171_v37  ;;  %v214_v23 = vand.u32 3, %v213_v14 }
  0xba   :  { %v175_v42 = vclz %v174_v40  ;;  %339 = vmatpush.bf16.msra.mxu1 %v410_v0 }
  0xbb   :  { %vm216_vm14 = vcmp.eq.s32.totalorder %v214_v23, 0  ;;  %vm219_vm15 = vcmp.eq.s32.totalorder %v214_v23, 2  ;;  %vm215_vm0 = vcmp.lt.s32.totalorder %v214_v23, 2 }
  0xbc   :  { %v365_v43 = vadd.s32 4294967294, %v175_v42 }
  0xbe   :  { %vm366_vm11 = vcmp.lt.s32.totalorder %v365_v43, 0 }
  0xbf   :  { %v178_v19 = vsel %vm366_vm11, 0, %v365_v43 }
  0xc0   :  { %v179_v45 = vsub.s32 32, %v178_v19  ;;  %v183_v46 = vsub.s32 4294967266, %v178_v19  ;;  %v180_v47 = vshll.u32 %v171_v37, %v178_v19 }
  0xc2   :  { %v181_v48 = vshrl.u32 %v163_v44, %v179_v45  ;;  %v184_v49 = vadd.s32 127, %v183_v46 }
  0xc4   :  { %v182_v41 = vor.u32 %v181_v48, %v180_v47  ;;  %v185_v50 = vshll.u32 %v184_v49, 23 }
  0xc6   :  { %v186_v51 = vor.u32 4788187, %v185_v50  ;;  %v189_v54 = vcvt.s32.f32 %v182_v41 }
  0xc8   :  { %v187_v53 = vand.u32 2147483647, %v186_v51 }
  0xca   :  { %v190_v56 = vmul.f32 %v189_v54, %v187_v53 }
  0xcc   :  { %v191_v57 = vxor.u32 2147483648, %v190_v56 }
  0xce   :  { %v192_v60 = vsel %vm71_vm12, %v191_v57, %v190_v56 }
  0xcf   :  { %v195_v62 = vsel %vm634_vm13, %v576_v7, %v192_v60  ;;  %v434_v7 = vld [vmem:[%s658_s5] ss:$0 sm:$0xff] }
  0xd0   :  { %v197_v63 = vmul.f32 %v195_v62, %v195_v62 }
  0xd2   :  { %v198_v2 = vmul.f32 -0.001358992, %v197_v63  ;;  %v205_v3 = vmul.f32 -0.00019511016, %v197_v63 }
  0xd4   :  { %v199_v5 = vadd.f32 0.041655596, %v198_v2  ;;  %v206_v6 = vadd.f32 0.008332121, %v205_v3 }
  0xd6   :  { %v200_v9 = vmul.f32 %v199_v5, %v197_v63  ;;  %v207_v10 = vmul.f32 %v206_v6, %v197_v63 }
  0xd8   :  { %v201_v11 = vadd.f32 -0.4999988, %v200_v9  ;;  %v208_v13 = vadd.f32 -0.16666654, %v207_v10 }
  0xda   :  { %v202_v16 = vmul.f32 %v201_v11, %v197_v63  ;;  %v209_v18 = vmul.f32 %v208_v13, %v197_v63 }
  0xdc   :  { %v203_v21 = vadd.f32 1.0, %v202_v16  ;;  %v210_v22 = vadd.f32 1.0, %v209_v18 }
  0xde   :  { %v211_v24 = vmul.f32 %v210_v22, %v195_v62  ;;  %v220_v25 = vxor.u32 2147483648, %v203_v21 }
  0xe0   :  { %v217_v26 = vxor.u32 2147483648, %v211_v24  ;;  %v221_v28 = vsel %vm219_vm15, %v220_v25, %v211_v24 }
  0xe2   :  { %v218_v27 = vsel %vm216_vm14, %v203_v21, %v217_v26 }
  0xe3   :  { %v222_v29 = vsel %vm215_vm0, %v218_v27, %v221_v28 }
  0xe4   :  { %v223_v17 = vsel %vm212_vm1, nan, %v222_v29 }
  0xe5   :  { %v224_v20 = vpack.c.bf16 %v223_v17, %v223_v17 }
  0xe7   :  { %375 = vmatmul.msk.bf16.vlgmr.msra.gmra.mxu0 %vm245_vm2, %v224_v20 }
 0x164   :  { %v258_v32 = vpop.f32.mrf.mxu0 }
 0x165   :  { %v259_v33 = vadd.f32 %v433_v31, %v258_v32 }
 0x167   :  { %v262_v34 = vmax.f32 %v259_v33, 0.0 }
 0x169   :  { %v263_v35 = vpack.c.bf16 %v262_v34, %v262_v34 }
 0x16b   :  { %340 = vmatmul.bf16.vlgmr.msra.gmra.mxu1 %v263_v35 }
 0x16c   :  { %v260_v36 = vpop.f32.mrf.mxu0 }
 0x1e8   :  { %v341_v38 = vpop.f32.mrf.mxu1 }
 0x1e9   :  { %v342_v37 = vadd.f32 %v434_v7, %v341_v38 }
 0x1eb   :  { %345 = vst [vmem:[#allocation7] sm:$0xff] %v342_v37 }
 0x1ec   :  { %356 = dma.vmem_to_hbm [thread:$0]  %s352_s16, 128, %s354_s19, [#allocation4]  }
 0x1f0   :  { %v343_v39 = vpop.f32.mrf.mxu1 }
 0x1f1   :  { %511 = dma.done.wait [#allocation4], 128  }
 0x1f2   :  { %512 = vsyncadd [#allocation4], 4294967168 }
 0x1f3   :  { %361 = vsyncpa [#allocation3], 1 }
 0x1f4   :  { %362 = vsyncpa [#allocation6], 1 }
 0x1f5   :  { %363 = vsyncpa [#allocation4], 1 }

</bundles_post_ra>
